<compile_context>
chip_gen: v7x
topology: tpu7x:2x2x1
jax: 0.10.0
libtpu: 0.0.40
codegen_flags: <defaults>
</compile_context>

<pallas_src>
import functools
from typing import NamedTuple

import jax
import jax.numpy as jnp
from jax.experimental import pallas as pl
from jax.experimental.pallas import tpu as pltpu

_INV_SQRT2 = 0.7071067811865476


def _round_up(n: int, m: int) -> int:
    return ((n + m - 1) // m) * m


def _device_kind() -> str:
    try:
        return jax.devices()[0].device_kind.lower()
    except Exception:
        return ""


def _vmem_capacity_bytes() -> int:
    """Physical VMEM of the local chip (64 MiB on v7x, 128 MiB on v5e/v6e)."""
    try:
        cap = getattr(pltpu.get_tpu_info(), "vmem_capacity_bytes", None)
        if cap:
            return int(cap)
    except Exception:
        pass
    return (64 << 20) if "v7" in _device_kind() else (128 << 20)


def _gelu_f32(h, approximate):
    if approximate:
        # tanh-approx GELU lowers to the EUP (otherwise-idle bundle slot).
        return jax.nn.gelu(h, approximate=True)
    # exact erf GELU (matches torch.nn.GELU default)
    return 0.5 * h * (1.0 + jax.lax.erf(h * _INV_SQRT2))


def _maybe_single_buffered(block_shape, index_map, single_buffer):
    """Resident (constant index_map) operands only need one VMEM buffer."""
    if single_buffer and hasattr(pl, "Buffered"):
        return pl.BlockSpec(block_shape, index_map, pipeline_mode=pl.Buffered(1))
    return pl.BlockSpec(block_shape, index_map)


# ------------------------------ kernels ------------------------------------


def _fc_kernel_resident(x_ref, w1_ref, b1_ref, w2_ref, b2_ref, o_ref, *,
                        compute_dtype, approximate_gelu):
    # dense1: [TB, Dp] @ [Dp, Hp] + [1, Hp]  (f32 accumulation on the MXU)
    h = jnp.dot(x_ref[...], w1_ref[...],
                preferred_element_type=jnp.float32) + b1_ref[...]
    h = _gelu_f32(h, approximate_gelu)
    # dropout1: identity (eval mode)
    # dense2: [TB, Hp] @ [Hp, Op] + [1, Op]
    o = jnp.dot(h.astype(compute_dtype), w2_ref[...],
                preferred_element_type=jnp.float32) + b2_ref[...]
    # dropout2: identity (eval mode)
    o_ref[...] = o.astype(o_ref.dtype)


def _fc_kernel_ktiled(x_ref, w1_ref, b1_ref, w2_ref, b2_ref, o_ref, acc_ref, *,
                      compute_dtype, approximate_gelu):
    # Grid: (batch tiles, hidden tiles).  acc accumulates the dense2 output.
    k = pl.program_id(1)

    @pl.when(k == 0)
    def _():
        acc_ref[...] = jnp.zeros_like(acc_ref)

    h = jnp.dot(x_ref[...], w1_ref[...],
                preferred_element_type=jnp.float32) + b1_ref[...]
    h = _gelu_f32(h, approximate_gelu)
    acc_ref[...] += jnp.dot(h.astype(compute_dtype), w2_ref[...],
                            preferred_element_type=jnp.float32)

    @pl.when(k == pl.num_programs(1) - 1)
    def _():
        o_ref[...] = (acc_ref[...] + b2_ref[...]).astype(o_ref.dtype)


# --------------------------- parameter prep --------------------------------


class FCParams(NamedTuple):
    w1: jax.Array   # [Dp, Hp]  compute dtype (bf16 by default)
    b1: jax.Array   # [1, Hp]   f32
    w2: jax.Array   # [Hp, Op]  compute dtype
    b2: jax.Array   # [1, Op]   f32
    din: int
    hidden: int
    dout: int


def prepare_fc_params(w1, b1, w2, b2, *, use_bf16=True) -> FCParams:
    """Pad feature dims to multiples of 128 and cast weights ONCE, at init."""
    w1 = jnp.asarray(w1)
    w2 = jnp.asarray(w2)
    b1 = jnp.asarray(b1).reshape(1, -1)
    b2 = jnp.asarray(b2).reshape(1, -1)
    din, hid = w1.shape
    hid2, dout = w2.shape
    assert hid == hid2 and b1.shape[1] == hid and b2.shape[1] == dout

    dp, hp, op = _round_up(din, 128), _round_up(hid, 128), _round_up(dout, 128)
    cd = jnp.bfloat16 if use_bf16 else w1.dtype
    w1p = jnp.pad(w1, ((0, dp - din), (0, hp - hid))).astype(cd)
    w2p = jnp.pad(w2, ((0, hp - hid), (0, op - dout))).astype(cd)
    b1p = jnp.pad(b1, ((0, 0), (0, hp - hid))).astype(jnp.float32)
    b2p = jnp.pad(b2, ((0, 0), (0, op - dout))).astype(jnp.float32)
    return FCParams(w1p, b1p, w2p, b2p, din, hid, dout)


# ------------------------------ wrapper -------------------------------------


def fc_layer(x, params: FCParams, *, block_b=256, approximate_gelu=True,
             force_k_tiled=False, h_tile=512):
    """Fused FCLayer forward: dense2(gelu(dense1(x))); dropout = identity (eval).

    x: [..., din].  Returns [..., dout] in x.dtype.
    """
    orig_shape = x.shape
    if x.ndim != 2:
        x = x.reshape(-1, orig_shape[-1])
    B, Din = x.shape
    assert Din == params.din, (Din, params.din)

    Dp, Hp = params.w1.shape
    Op = params.w2.shape[1]
    out_dtype = x.dtype
    compute_dtype = params.w1.dtype
    wbytes = jnp.dtype(compute_dtype).itemsize
    xbytes = wbytes  # x is cast to the compute dtype in the wrapper

    kind = _device_kind()
    num_cores = 2 if "v7" in kind else 1        # v7x: 2 TensorCores / chip
    mxu_m = 128 if "v5" in kind else 256        # MXU M tile (v5e: 4x128^2)
    sublane = 16 if compute_dtype == jnp.bfloat16 else 8

    # VMEM budget: physical capacity minus headroom for compiler scratch/sems.
    vmem_cap = max(_vmem_capacity_bytes() - (16 << 20), 24 << 20)

    # --- path selection: fully-resident weights vs K-tiled over the hidden dim
    weight_bytes = (Dp * Hp + Hp * Op) * wbytes + (Hp + Op) * 4
    use_ktiled = force_k_tiled or (weight_bytes > 0.45 * vmem_cap)

    if use_ktiled:
        tH = 128
        cap_h = min(Hp, _round_up(max(h_tile, 128), 128))
        for cand in (512, 384, 256, 128):
            if cand <= cap_h and Hp % cand == 0:
                tH = cand
                break
        h_cols = tH
        streamed_bytes = 2 * ((Dp * tH + tH * Op) * wbytes + (tH + Op) * 4)
    else:
        tH = Hp
        h_cols = Hp
        streamed_bytes = 2 * weight_bytes       # worst case (fallback double-buffer)

    # --- batch tile: sized to the MXU M dim, clamped by VMEM and the batch ----
    def _act_bytes(tb_):
        return (2 * tb_ * Dp * xbytes           # double-buffered x tiles
                + 2 * tb_ * Op * 4              # double-buffered out tiles (f32)
                + tb_ * h_cols * 6              # f32 h + its compute-dtype copy
                + (tb_ * Op * 4 if use_ktiled else 0))   # accumulator scratch

    tb = _round_up(max(block_b, sublane), mxu_m)
    tb = min(tb, _round_up(B, sublane))
    tb = max(_round_up(tb, sublane), sublane)
    act_budget = max(vmem_cap - streamed_bytes, 4 << 20)
    while tb > sublane and _act_bytes(tb) > act_budget:
        tb = max(_round_up(tb // 2, sublane), sublane)
    # v7x: make sure the (parallel) batch grid has work for both TensorCores.
    while num_cores > 1 and (_round_up(B, tb) // tb) < num_cores and tb > sublane:
        tb = max(_round_up(tb // 2, sublane), sublane)

    Bp = _round_up(B, tb)
    nb = Bp // tb
    nk = Hp // tH

    xp = jnp.pad(x, ((0, Bp - B), (0, Dp - Din))).astype(compute_dtype)

    vmem_bytes = int(1.4 * (streamed_bytes + _act_bytes(tb))) + (4 << 20)
    vmem_bytes = max(16 << 20, min(vmem_bytes, vmem_cap))

    cost = pl.CostEstimate(
        flops=2 * B * (params.din * params.hidden + params.hidden * params.dout),
        transcendentals=B * params.hidden,      # GELU
        bytes_accessed=int(Bp * Dp * xbytes
                           + (nb if use_ktiled else 1) * weight_bytes
                           + Bp * Op * 4),
    )

    def _run(single_buffer_resident):
        if use_ktiled:
            kernel = functools.partial(_fc_kernel_ktiled,
                                       compute_dtype=compute_dtype,
                                       approximate_gelu=approximate_gelu)
            grid = (nb, nk)
            in_specs = [
                pl.BlockSpec((tb, Dp), lambda i, k: (i, 0)),    # x (revisited over k)
                pl.BlockSpec((Dp, tH), lambda i, k: (0, k)),    # w1 column tile
                pl.BlockSpec((1, tH), lambda i, k: (0, k)),     # b1 tile
                pl.BlockSpec((tH, Op), lambda i, k: (k, 0)),    # w2 row tile
                _maybe_single_buffered((1, Op), lambda i, k: (0, 0),
                                       single_buffer_resident),  # b2 (resident)
            ]
            out_spec = pl.BlockSpec((tb, Op), lambda i, k: (i, 0))
            scratch = [pltpu.VMEM((tb, Op), jnp.float32)]
            dims = ("parallel", "arbitrary")
        else:
            kernel = functools.partial(_fc_kernel_resident,
                                       compute_dtype=compute_dtype,
                                       approximate_gelu=approximate_gelu)
            grid = (nb,)
            in_specs = [
                pl.BlockSpec((tb, Dp), lambda i: (i, 0)),       # x tile (pipelined)
                _maybe_single_buffered((Dp, Hp), lambda i: (0, 0), single_buffer_resident),
                _maybe_single_buffered((1, Hp), lambda i: (0, 0), single_buffer_resident),
                _maybe_single_buffered((Hp, Op), lambda i: (0, 0), single_buffer_resident),
                _maybe_single_buffered((1, Op), lambda i: (0, 0), single_buffer_resident),
            ]
            out_spec = pl.BlockSpec((tb, Op), lambda i: (i, 0))  # lane-dense store
            scratch = []
            dims = ("parallel",)

        return pl.pallas_call(
            kernel,
            out_shape=jax.ShapeDtypeStruct((Bp, Op), out_dtype),
            grid_spec=pltpu.PrefetchScalarGridSpec(
                num_scalar_prefetch=0,
                grid=grid,
                in_specs=in_specs,
                out_specs=out_spec,
                scratch_shapes=scratch,
            ),
            compiler_params=pltpu.CompilerParams(
                dimension_semantics=dims,
                vmem_limit_bytes=vmem_bytes,
            ),
            cost_estimate=cost,
        )(xp, params.w1, params.b1, params.w2, params.b2)

    try:
        out_padded = _run(True)
    except Exception:
        # pipeline_mode=pl.Buffered(1) unsupported in this Pallas build:
        # fall back to default double-buffered resident operands.
        out_padded = _run(False)

    out = out_padded[:B, :params.dout]
    if len(orig_shape) != 2:
        out = out.reshape(orig_shape[:-1] + (params.dout,))
    return out


# ------------------------------- test ---------------------------------------


if __name__ == "__main__":
    # Small shapes implied by the module: LazyLinear infers Din from x.
    B, Din = 40, 32          # batch (non-multiple of block -> exercises padding)
    H, O = 64, 32            # mlp_num_hiddens, mlp_num_outputs

    key = jax.random.PRNGKey(0)
    kx, k1, k2, k3, k4 = jax.random.split(key, 5)

    x = jax.random.normal(kx, (B, Din), dtype=jnp.float32)
    # Deterministic synthetic parameters (not a checkpoint load).
    w1 = jax.random.normal(k1, (Din, H), dtype=jnp.float32) * 0.05
    b1 = jax.random.normal(k2, (1, H), dtype=jnp.float32) * 0.05
    w2 = jax.random.normal(k3, (H, O), dtype=jnp.float32) * 0.05
    b2 = jax.random.normal(k4, (1, O), dtype=jnp.float32) * 0.05

    # Pure-JAX reference (eval-mode forward, f32, exact erf GELU).
    h_ref = x @ w1 + b1
    h_ref = 0.5 * h_ref * (1.0 + jax.lax.erf(h_ref / jnp.sqrt(2.0)))
    ref = h_ref @ w2 + b2

    # f32 resident path, exact erf GELU: tight match with the reference.
    p_f32 = prepare_fc_params(w1, b1, w2, b2, use_bf16=False)
    out_f32 = jax.block_until_ready(
        fc_layer(x, p_f32, block_b=16, approximate_gelu=False))
    assert out_f32.shape == (B, O)
    assert jnp.allclose(out_f32, ref, atol=1e-5, rtol=1e-5)

    # Default path: bf16 matmuls (f32 accumulation) + tanh GELU, weights
    # prepared once at init: loose tolerance vs the f32/erf reference.
    p_bf16 = prepare_fc_params(w1, b1, w2, b2, use_bf16=True)
    out_bf16 = jax.block_until_ready(fc_layer(x, p_bf16))
    assert out_bf16.shape == (B, O)
    assert jnp.allclose(out_bf16, ref, atol=2e-2, rtol=2e-2)

    # K-tiled large-H path (forced, multi-step hidden grid with accumulator).
    H2 = 256
    w1b = jax.random.normal(k1, (Din, H2), dtype=jnp.float32) * 0.05
    b1b = jax.random.normal(k2, (1, H2), dtype=jnp.float32) * 0.05
    w2b = jax.random.normal(k3, (H2, O), dtype=jnp.float32) * 0.05
    h2_ref = x @ w1b + b1b
    h2_ref = 0.5 * h2_ref * (1.0 + jax.lax.erf(h2_ref / jnp.sqrt(2.0)))
    ref2 = h2_ref @ w2b + b2
    p_kt = prepare_fc_params(w1b, b1b, w2b, b2, use_bf16=False)
    out_kt = jax.block_until_ready(
        fc_layer(x, p_kt, block_b=16, approximate_gelu=False,
                 force_k_tiled=True, h_tile=128))
    assert out_kt.shape == (B, O)
    assert jnp.allclose(out_kt, ref2, atol=1e-5, rtol=1e-5)

    print("KERNEL_OK")
</pallas_src>

<mosaic_0001>
module attributes {stable_mosaic.version = 11 : i64} {
  func.func @_fc_kernel_resident(%arg0: i32, %arg1: memref<40x128xf32, #tpu.memory_space<vmem>>, %arg2: memref<128x128xf32, #tpu.memory_space<vmem>>, %arg3: memref<1x128xf32, #tpu.memory_space<vmem>>, %arg4: memref<128x128xf32, #tpu.memory_space<vmem>>, %arg5: memref<1x128xf32, #tpu.memory_space<vmem>>, %arg6: memref<40x128xf32, #tpu.memory_space<vmem>>) attributes {dimension_semantics = [#tpu.dimension_semantics<parallel>], iteration_bounds = array<i64: 1>, scalar_prefetch = 0 : i64, scratch_operands = 0 : i64, tpu.core_type = #tpu.core_type<tc>, window_params = [{transform_indices = @transform_0, window_bounds = array<i64: 40, 128>}, {pipeline_mode = #tpu.pipeline_mode<synchronous>, transform_indices = @transform_1, window_bounds = array<i64: 128, 128>}, {pipeline_mode = #tpu.pipeline_mode<synchronous>, transform_indices = @transform_2, window_bounds = array<i64: 1, 128>}, {pipeline_mode = #tpu.pipeline_mode<synchronous>, transform_indices = @transform_3, window_bounds = array<i64: 128, 128>}, {pipeline_mode = #tpu.pipeline_mode<synchronous>, transform_indices = @transform_4, window_bounds = array<i64: 1, 128>}, {transform_indices = @transform_5, window_bounds = array<i64: 40, 128>}]} {
    %c0 = arith.constant 0 : index
    %c0_0 = arith.constant 0 : index
    %0 = vector.load %arg1[%c0, %c0_0] : memref<40x128xf32, #tpu.memory_space<vmem>>, vector<40x128xf32>
    %c0_1 = arith.constant 0 : index
    %c0_2 = arith.constant 0 : index
    %1 = vector.load %arg2[%c0_1, %c0_2] : memref<128x128xf32, #tpu.memory_space<vmem>>, vector<128x128xf32>
    %cst = arith.constant dense<0.000000e+00> : vector<40x128xf32>
    %2 = tpu.matmul %0, %1, %cst {dimension_numbers = #tpu.dot_dimension_numbers<[1], [0], [0], [1], [0, 0, 1, 1], [], []>} : vector<40x128xf32>, vector<128x128xf32>, vector<40x128xf32> -> vector<40x128xf32>
    %c0_3 = arith.constant 0 : index
    %c0_4 = arith.constant 0 : index
    %3 = vector.load %arg3[%c0_3, %c0_4] : memref<1x128xf32, #tpu.memory_space<vmem>>, vector<1x128xf32>
    %4 = vector.broadcast %3 : vector<1x128xf32> to vector<40x128xf32>
    %5 = arith.addf %2, %4 : vector<40x128xf32>
    %cst_5 = arith.constant 5.000000e-01 : f32
    %6 = vector.broadcast %cst_5 : f32 to vector<40x128xf32>
    %7 = arith.mulf %6, %5 : vector<40x128xf32>
    %cst_6 = arith.constant 0.707106769 : f32
    %8 = vector.broadcast %cst_6 : f32 to vector<40x128xf32>
    %9 = arith.mulf %5, %8 : vector<40x128xf32>
    %10 = math.erf %9 : vector<40x128xf32>
    %cst_7 = arith.constant 1.000000e+00 : f32
    %11 = vector.broadcast %cst_7 : f32 to vector<40x128xf32>
    %12 = arith.addf %11, %10 : vector<40x128xf32>
    %13 = arith.mulf %7, %12 : vector<40x128xf32>
    %c0_8 = arith.constant 0 : index
    %c0_9 = arith.constant 0 : index
    %14 = vector.load %arg4[%c0_8, %c0_9] : memref<128x128xf32, #tpu.memory_space<vmem>>, vector<128x128xf32>
    %cst_10 = arith.constant dense<0.000000e+00> : vector<40x128xf32>
    %15 = tpu.matmul %13, %14, %cst_10 {dimension_numbers = #tpu.dot_dimension_numbers<[1], [0], [0], [1], [0, 0, 1, 1], [], []>} : vector<40x128xf32>, vector<128x128xf32>, vector<40x128xf32> -> vector<40x128xf32>
    %c0_11 = arith.constant 0 : index
    %c0_12 = arith.constant 0 : index
    %16 = vector.load %arg5[%c0_11, %c0_12] : memref<1x128xf32, #tpu.memory_space<vmem>>, vector<1x128xf32>
    %17 = vector.broadcast %16 : vector<1x128xf32> to vector<40x128xf32>
    %18 = arith.addf %15, %17 : vector<40x128xf32>
    %c0_13 = arith.constant 0 : index
    %c0_14 = arith.constant 0 : index
    %19 = vector.load %arg6[%c0_13, %c0_14] : memref<40x128xf32, #tpu.memory_space<vmem>>, vector<40x128xf32>
    tpu.vector_store %arg6[%c0_13, %c0_14], %18 {strides = array<i32>} : memref<40x128xf32, #tpu.memory_space<vmem>>, vector<40x128xf32>,
    return
  }
  func.func @transform_0(%arg0: i32) -> (i32, i32) {
    %c0_i32 = arith.constant 0 : i32
    %c0_i32_0 = arith.constant 0 : i32
    return %arg0, %c0_i32 : i32, i32
  }
  func.func @transform_1(%arg0: i32) -> (i32, i32) {
    %c0_i32 = arith.constant 0 : i32
    %c0_i32_0 = arith.constant 0 : i32
    %c0_i32_1 = arith.constant 0 : i32
    return %c0_i32, %c0_i32_0 : i32, i32
  }
  func.func @transform_2(%arg0: i32) -> (i32, i32) {
    %c0_i32 = arith.constant 0 : i32
    %c0_i32_0 = arith.constant 0 : i32
    %c0_i32_1 = arith.constant 0 : i32
    return %c0_i32, %c0_i32_0 : i32, i32
  }
  func.func @transform_3(%arg0: i32) -> (i32, i32) {
    %c0_i32 = arith.constant 0 : i32
    %c0_i32_0 = arith.constant 0 : i32
    %c0_i32_1 = arith.constant 0 : i32
    return %c0_i32, %c0_i32_0 : i32, i32
  }
  func.func @transform_4(%arg0: i32) -> (i32, i32) {
    %c0_i32 = arith.constant 0 : i32
    %c0_i32_0 = arith.constant 0 : i32
    %c0_i32_1 = arith.constant 0 : i32
    return %c0_i32, %c0_i32_0 : i32, i32
  }
  func.func @transform_5(%arg0: i32) -> (i32, i32) {
    %c0_i32 = arith.constant 0 : i32
    %c0_i32_0 = arith.constant 0 : i32
    return %arg0, %c0_i32 : i32, i32
  }
}

module attributes {stable_mosaic.version = 11 : i64} {
  func.func @_fc_kernel_resident(%arg0: i32, %arg1: memref<40x128xf32, #tpu.memory_space<vmem>>, %arg2: memref<128x128xf32, #tpu.memory_space<vmem>>, %arg3: memref<1x128xf32, #tpu.memory_space<vmem>>, %arg4: memref<128x128xf32, #tpu.memory_space<vmem>>, %arg5: memref<1x128xf32, #tpu.memory_space<vmem>>, %arg6: memref<40x128xf32, #tpu.memory_space<vmem>>) attributes {dimension_semantics = [#tpu.dimension_semantics<parallel>], iteration_bounds = array<i64: 1>, scalar_prefetch = 0 : i64, scratch_operands = 0 : i64, tpu.core_type = #tpu.core_type<tc>, window_params = [{transform_indices = @transform_0, window_bounds = array<i64: 40, 128>}, {pipeline_mode = #tpu.pipeline_mode<synchronous>, transform_indices = @transform_1, window_bounds = array<i64: 128, 128>}, {pipeline_mode = #tpu.pipeline_mode<synchronous>, transform_indices = @transform_2, window_bounds = array<i64: 1, 128>}, {pipeline_mode = #tpu.pipeline_mode<synchronous>, transform_indices = @transform_3, window_bounds = array<i64: 128, 128>}, {pipeline_mode = #tpu.pipeline_mode<synchronous>, transform_indices = @transform_4, window_bounds = array<i64: 1, 128>}, {transform_indices = @transform_5, window_bounds = array<i64: 40, 128>}]} {
    %c0 = arith.constant 0 : index
    %c0_0 = arith.constant 0 : index
    %0 = vector.load %arg1[%c0, %c0_0] : memref<40x128xf32, #tpu.memory_space<vmem>>, vector<40x128xf32>
    %c0_1 = arith.constant 0 : index
    %c0_2 = arith.constant 0 : index
    %1 = vector.load %arg2[%c0_1, %c0_2] : memref<128x128xf32, #tpu.memory_space<vmem>>, vector<128x128xf32>
    %cst = arith.constant dense<0.000000e+00> : vector<40x128xf32>
    %2 = tpu.matmul %0, %1, %cst {dimension_numbers = #tpu.dot_dimension_numbers<[1], [0], [0], [1], [0, 0, 1, 1], [], []>} : vector<40x128xf32>, vector<128x128xf32>, vector<40x128xf32> -> vector<40x128xf32>
    %c0_3 = arith.constant 0 : index
    %c0_4 = arith.constant 0 : index
    %3 = vector.load %arg3[%c0_3, %c0_4] : memref<1x128xf32, #tpu.memory_space<vmem>>, vector<1x128xf32>
    %4 = vector.broadcast %3 : vector<1x128xf32> to vector<40x128xf32>
    %5 = arith.addf %2, %4 : vector<40x128xf32>
    %cst_5 = arith.constant 5.000000e-01 : f32
    %6 = vector.broadcast %cst_5 : f32 to vector<40x128xf32>
    %7 = arith.mulf %6, %5 : vector<40x128xf32>
    %cst_6 = arith.constant 0.707106769 : f32
    %8 = vector.broadcast %cst_6 : f32 to vector<40x128xf32>
    %9 = arith.mulf %5, %8 : vector<40x128xf32>
    %10 = math.erf %9 : vector<40x128xf32>
    %cst_7 = arith.constant 1.000000e+00 : f32
    %11 = vector.broadcast %cst_7 : f32 to vector<40x128xf32>
    %12 = arith.addf %11, %10 : vector<40x128xf32>
    %13 = arith.mulf %7, %12 : vector<40x128xf32>
    %c0_8 = arith.constant 0 : index
    %c0_9 = arith.constant 0 : index
    %14 = vector.load %arg4[%c0_8, %c0_9] : memref<128x128xf32, #tpu.memory_space<vmem>>, vector<128x128xf32>
    %cst_10 = arith.constant dense<0.000000e+00> : vector<40x128xf32>
    %15 = tpu.matmul %13, %14, %cst_10 {dimension_numbers = #tpu.dot_dimension_numbers<[1], [0], [0], [1], [0, 0, 1, 1], [], []>} : vector<40x128xf32>, vector<128x128xf32>, vector<40x128xf32> -> vector<40x128xf32>
    %c0_11 = arith.constant 0 : index
    %c0_12 = arith.constant 0 : index
    %16 = vector.load %arg5[%c0_11, %c0_12] : memref<1x128xf32, #tpu.memory_space<vmem>>, vector<1x128xf32>
    %17 = vector.broadcast %16 : vector<1x128xf32> to vector<40x128xf32>
    %18 = arith.addf %15, %17 : vector<40x128xf32>
    %c0_13 = arith.constant 0 : index
    %c0_14 = arith.constant 0 : index
    %19 = vector.load %arg6[%c0_13, %c0_14] : memref<40x128xf32, #tpu.memory_space<vmem>>, vector<40x128xf32>
    tpu.vector_store %arg6[%c0_13, %c0_14], %18 {strides = array<i32>} : memref<40x128xf32, #tpu.memory_space<vmem>>, vector<40x128xf32>,
    return
  }
  func.func @transform_0(%arg0: i32) -> (i32, i32) {
    %c0_i32 = arith.constant 0 : i32
    %c0_i32_0 = arith.constant 0 : i32
    return %arg0, %c0_i32 : i32, i32
  }
  func.func @transform_1(%arg0: i32) -> (i32, i32) {
    %c0_i32 = arith.constant 0 : i32
    %c0_i32_0 = arith.constant 0 : i32
    %c0_i32_1 = arith.constant 0 : i32
    return %c0_i32, %c0_i32_0 : i32, i32
  }
  func.func @transform_2(%arg0: i32) -> (i32, i32) {
    %c0_i32 = arith.constant 0 : i32
    %c0_i32_0 = arith.constant 0 : i32
    %c0_i32_1 = arith.constant 0 : i32
    return %c0_i32, %c0_i32_0 : i32, i32
  }
  func.func @transform_3(%arg0: i32) -> (i32, i32) {
    %c0_i32 = arith.constant 0 : i32
    %c0_i32_0 = arith.constant 0 : i32
    %c0_i32_1 = arith.constant 0 : i32
    return %c0_i32, %c0_i32_0 : i32, i32
  }
  func.func @transform_4(%arg0: i32) -> (i32, i32) {
    %c0_i32 = arith.constant 0 : i32
    %c0_i32_0 = arith.constant 0 : i32
    %c0_i32_1 = arith.constant 0 : i32
    return %c0_i32, %c0_i32_0 : i32, i32
  }
  func.func @transform_5(%arg0: i32) -> (i32, i32) {
    %c0_i32 = arith.constant 0 : i32
    %c0_i32_0 = arith.constant 0 : i32
    return %arg0, %c0_i32 : i32, i32
  }
}

</mosaic_0001>

<bundles_post_ra>
// kernel: tpu_custom_call.1
= control target key start
LH: loop header
LB: loop body
LE: loop exit
PB: predicated region body
PF: predicated region fallthrough
CT: control target
= control target key end

     0   :  { %10 = vsyncpa [#allocation3], 0  ;;  %s788_s0 = inlined_call_operand.hbm [shape: f32[40,128], index: 0, kind: input, shape index: {}]   ;;  %s789_s1 = inlined_call_operand.hbm [shape: f32[128,128], index: 1, kind: input, shape index: {}]   ;;  %s790_s2 = inlined_call_operand.vmem [shape: f32[1,128], index: 2, kind: input, shape index: {}]   ;;  %s791_s3 = inlined_call_operand.hbm [shape: f32[128,128], index: 3, kind: input, shape index: {}]   ;;  %s792_s4 = inlined_call_operand.vmem [shape: f32[1,128], index: 4, kind: input, shape index: {}]   ;;  %s793_s5 = inlined_call_operand.hbm [shape: f32[40,128], index: 5, kind: output, shape index: {}]  }
   0x1   :  { %11 = vsyncpa [#allocation6], 0 }
   0x2   :  { %12 = vsyncpa [#allocation4], 0  ;;  %s640_s18 = smov [#allocation5]   ;;  %s641_s20 = smov [#allocation2]  }
   0x3   :  { %s30_s19 = sshll.u32 %s640_s18, 4  ;;  %s18_s21 = sshll.u32 %s641_s20, 4  ;;  %s31_s19 = int_to_ptr.vmem [resolvable:$true] %s30_s19  ;;  %s679_s21 = int_to_ptr.vmem [resolvable:$true] %s18_s21 }
   0x4   :  { %s546_s24 = scalar_lea.hbm %s789_s1, 2048 }
   0x5   :  { %p547_p0 = scmp.ne.s32.totalorder %s789_s1, %s546_s24  ;;  %p550_p1 = scmp.lt.u32.totalorder %s546_s24, %s789_s1 }
   0x7   :  { %p552_p2 = pnand %p550_p1, %p547_p0 }
   0x9   :  { %555 = shalt.err (!%p552_p2)
}
   0xa   :  { %s556_s29 = scalar_lea.vmem %s31_s19, 2048  ;;  %p561_p4 = scmp.lt.s32.totalorder %s31_s19, %s31_s19 }
   0xb   :  { %p557_p3 = scmp.ne.s32.totalorder %s31_s19, %s556_s29  ;;  %p562_p5 = scmp.lt.s32.totalorder %s556_s29, %s556_s29 }
   0xd   :  { %p563_p6 = por %p562_p5, %p561_p4 }
   0xf   :  { %p564_p7 = pnand %p563_p6, %p557_p3 }
  0x11   :  { %567 = shalt.err (!%p564_p7)
}
  0x12   :  { %s642_s30 = smov 128   ;;  %s643_s6 = smov 8  }
  0x13   :  { %36 = dma.hbm_to_vmem [thread:$0]  %s789_s1, 2048, %s31_s19, [#allocation6], %s642_s30, %s642_s30, %s643_s6  }
  0x14   :  { %s568_s11 = scalar_lea.hbm %s788_s0, 640 }
  0x15   :  { %p569_p8 = scmp.ne.s32.totalorder %s788_s0, %s568_s11  ;;  %p572_p9 = scmp.lt.u32.totalorder %s568_s11, %s788_s0 }
  0x17   :  { %p574_p10 = pnand %p572_p9, %p569_p8 }
  0x19   :  { %577 = shalt.err (!%p574_p10)
}
  0x1a   :  { %s578_s16 = scalar_lea.vmem %s679_s21, 640  ;;  %p583_p12 = scmp.lt.s32.totalorder %s679_s21, %s679_s21 }
  0x1b   :  { %p579_p11 = scmp.ne.s32.totalorder %s679_s21, %s578_s16  ;;  %p584_p13 = scmp.lt.s32.totalorder %s578_s16, %s578_s16 }
  0x1d   :  { %p585_p0 = por %p584_p13, %p583_p12 }
  0x1f   :  { %p586_p1 = pnand %p585_p0, %p579_p11 }
  0x21   :  { %589 = shalt.err (!%p586_p1)
}
  0x22   :  { %24 = dma.hbm_to_vmem [thread:$0]  %s788_s0, 640, %s679_s21, [#allocation3], %s642_s30, %s642_s30, %s643_s6  }
  0x23   :  { %s644_s18 = smov [#allocation7]   ;;  %s590_s23 = scalar_lea.hbm %s791_s3, 2048 }
  0x24   :  { %s44_s19 = sshll.u32 %s644_s18, 4  ;;  %p591_p2 = scmp.ne.s32.totalorder %s791_s3, %s590_s23  ;;  %s45_s19 = int_to_ptr.vmem [resolvable:$true] %s44_s19 }
  0x25   :  { %p594_p3 = scmp.lt.u32.totalorder %s590_s23, %s791_s3 }
  0x27   :  { %p596_p4 = pnand %p594_p3, %p591_p2 }
  0x29   :  { %599 = shalt.err (!%p596_p4)
}
  0x2a   :  { %s600_s28 = scalar_lea.vmem %s45_s19, 2048  ;;  %p605_p6 = scmp.lt.s32.totalorder %s45_s19, %s45_s19 }
  0x2b   :  { %p601_p5 = scmp.ne.s32.totalorder %s45_s19, %s600_s28  ;;  %p606_p7 = scmp.lt.s32.totalorder %s600_s28, %s600_s28 }
  0x2d   :  { %p607_p8 = por %p606_p7, %p605_p6 }
  0x2f   :  { %p608_p9 = pnand %p607_p8, %p601_p5 }
  0x31   :  { %611 = shalt.err (!%p608_p9)
}
  0x32   :  { %50 = dma.hbm_to_vmem [thread:$0]  %s791_s3, 2048, %s45_s19, [#allocation6], %s642_s30, %s642_s30, %s643_s6  }
  0x33   :  { %634 = dma.done.wait [#allocation3], 640  }
  0x34   :  { %635 = vsyncadd [#allocation3], 4294966656 }
  0x35   :  { %636 = dma.done.wait [#allocation6], 4096  }
  0x36   :  { %637 = vsyncadd [#allocation6], 4294963200  ;;  %v645_v0 = vmov 0.0|0.0   ;;  %vm646_vm0 = vmmov 0   ;;  %v647_v1 = vmov 0.0   ;;  %v67_v2 = vld [vmem:[#allocation5] sm:$0xff] }
  0x37   :  { %479 = vmatprep.subr.bf16.mxu0 %v645_v0  ;;  %417 = vmatprep.mubr.msk.f32.mxu0 %vm646_vm0, %v647_v1  ;;  %v68_v3 = vld [vmem:[#allocation5 + $0x8] sm:$0xff]  ;;  %v69_v4 = vld [vmem:[#allocation5 + $0x10] sm:$0xff]  ;;  %v70_v6 = vld [vmem:[#allocation5 + $0x18] sm:$0xff]  ;;  %s648_s8 = smov [#allocation8]  }
  0x38   :  { %503 = vmatprep.subr.bf16.mxu1 %v645_v0  ;;  %464 = vmatprep.mubr.msk.f32.mxu1 %vm646_vm0, %v647_v1  ;;  %v480_v5 = vpack.c.bf16 %v68_v3, %v67_v2  ;;  %v483_v7 = vpack.c.bf16 %v70_v6, %v69_v4  ;;  %v71_v8 = vld [vmem:[#allocation5 + $0x20] sm:$0xff]  ;;  %v72_v9 = vld [vmem:[#allocation5 + $0x28] sm:$0xff]  ;;  %v207_v13 = vld [vmem:[#allocation7 + $0x10] sm:$0xff]  ;;  %s328_s9 = sshll.u32 %s648_s8, 4  ;;  %s329_s9 = int_to_ptr.vmem [resolvable:$true] %s328_s9 }
  0x39   :  { %v486_v10 = vpack.c.bf16 %v72_v9, %v71_v8  ;;  %v205_v11 = vld [vmem:[#allocation7] sm:$0xff]  ;;  %v206_v12 = vld [vmem:[#allocation7 + $0x8] sm:$0xff]  ;;  %v73_v14 = vld [vmem:[#allocation5 + $0x30] sm:$0xff]  ;;  %p617_p11 = scmp.lt.s32.totalorder %s329_s9, %s329_s9 }
  0x3a   :  { %481 = vmatpush3.bf16.msra.mxu0 %v480_v5  ;;  %v74_v15 = vld [vmem:[#allocation5 + $0x38] sm:$0xff]  ;;  %v504_v16 = vpack.c.bf16 %v206_v12, %v205_v11  ;;  %v209_v20 = vld [vmem:[#allocation7 + $0x20] sm:$0xff]  ;;  %v210_v21 = vld [vmem:[#allocation7 + $0x28] sm:$0xff] }
  0x3b   :  { %482 = vmatprep.subr.bf16.mxu0 %v645_v0  ;;  %v208_v17 = vld [vmem:[#allocation7 + $0x18] sm:$0xff]  ;;  %v489_v19 = vpack.c.bf16 %v74_v15, %v73_v14  ;;  %v75_v22 = vld [vmem:[#allocation5 + $0x40] sm:$0xff]  ;;  %v76_v23 = vld [vmem:[#allocation5 + $0x48] sm:$0xff]  ;;  %v510_v24 = vpack.c.bf16 %v210_v21, %v209_v20 }
  0x3c   :  { %505 = vmatpush3.bf16.msra.mxu1 %v504_v16  ;;  %v507_v18 = vpack.c.bf16 %v208_v17, %v207_v13  ;;  %v492_v25 = vpack.c.bf16 %v76_v23, %v75_v22  ;;  %v77_v26 = vld [vmem:[#allocation5 + $0x50] sm:$0xff]  ;;  %v78_v27 = vld [vmem:[#allocation5 + $0x58] sm:$0xff]  ;;  %v79_v29 = vld [vmem:[#allocation5 + $0x60] sm:$0xff] }
  0x3d   :  { %506 = vmatprep.subr.bf16.mxu1 %v645_v0  ;;  %v495_v28 = vpack.c.bf16 %v78_v27, %v77_v26  ;;  %v80_v30 = vld [vmem:[#allocation5 + $0x68] sm:$0xff]  ;;  %v81_v32 = vld [vmem:[#allocation5 + $0x70] sm:$0xff]  ;;  %v82_v33 = vld [vmem:[#allocation5 + $0x78] sm:$0xff] }
  0x3e   :  { %484 = vmatpush3.bf16.msra.mxu0 %v483_v7  ;;  %v498_v31 = vpack.c.bf16 %v80_v30, %v79_v29  ;;  %v501_v34 = vpack.c.bf16 %v82_v33, %v81_v32  ;;  %v62_v35 = vld [vmem:[#allocation2] sm:$0xff]  ;;  %v63_v36 = vld [vmem:[#allocation2 + $0x8] sm:$0xff]  ;;  %v64_v37 = vld [vmem:[#allocation2 + $0x10] sm:$0xff] }
  0x3f   :  { %485 = vmatprep.subr.bf16.mxu0 %v645_v0  ;;  %v65_v38 = vld [vmem:[#allocation2 + $0x18] sm:$0xff]  ;;  %v66_v39 = vld [vmem:[#allocation2 + $0x20] sm:$0xff]  ;;  %v213_v43 = vld [vmem:[#allocation7 + $0x40] sm:$0xff] }
  0x40   :  { %508 = vmatpush3.bf16.msra.mxu1 %v507_v18  ;;  %v211_v40 = vld [vmem:[#allocation7 + $0x30] sm:$0xff]  ;;  %v212_v41 = vld [vmem:[#allocation7 + $0x38] sm:$0xff]  ;;  %v214_v44 = vld [vmem:[#allocation7 + $0x48] sm:$0xff] }
  0x41   :  { %509 = vmatprep.subr.bf16.mxu1 %v645_v0  ;;  %v513_v42 = vpack.c.bf16 %v212_v41, %v211_v40  ;;  %v516_v45 = vpack.c.bf16 %v214_v44, %v213_v43  ;;  %v215_v46 = vld [vmem:[#allocation7 + $0x50] sm:$0xff]  ;;  %v216_v47 = vld [vmem:[#allocation7 + $0x58] sm:$0xff]  ;;  %v217_v49 = vld [vmem:[#allocation7 + $0x60] sm:$0xff] }
  0x42   :  { %487 = vmatpush3.bf16.msra.mxu0 %v486_v10  ;;  %v519_v48 = vpack.c.bf16 %v216_v47, %v215_v46  ;;  %v218_v50 = vld [vmem:[#allocation7 + $0x68] sm:$0xff]  ;;  %v219_v52 = vld [vmem:[#allocation7 + $0x70] sm:$0xff]  ;;  %v220_v53 = vld [vmem:[#allocation7 + $0x78] sm:$0xff] }
  0x43   :  { %488 = vmatprep.subr.bf16.mxu0 %v645_v0  ;;  %v522_v51 = vpack.c.bf16 %v218_v50, %v217_v49  ;;  %v525_v54 = vpack.c.bf16 %v220_v53, %v219_v52  ;;  %v341_v55 = vld [vmem:[%s790_s2] ss:$0 sm:$0xff] }
  0x44   :  { %511 = vmatpush3.bf16.msra.mxu1 %v510_v24  ;;  %v342_v33 = vld [vmem:[%s792_s4] ss:$0 sm:$0xff]  ;;  %s612_s4 = scalar_lea.vmem %s329_s9, 640 }
  0x45   :  { %512 = vmatprep.subr.bf16.mxu1 %v645_v0  ;;  %p613_p10 = scmp.ne.s32.totalorder %s329_s9, %s612_s4  ;;  %p618_p12 = scmp.lt.s32.totalorder %s612_s4, %s612_s4 }
  0x46   :  { %490 = vmatpush3.bf16.msra.mxu0 %v489_v19 }
  0x47   :  { %491 = vmatprep.subr.bf16.mxu0 %v645_v0  ;;  %p619_p13 = por %p618_p12, %p617_p11 }
  0x48   :  { %514 = vmatpush3.bf16.msra.mxu1 %v513_v42 }
  0x49   :  { %515 = vmatprep.subr.bf16.mxu1 %v645_v0  ;;  %p620_p0 = pnand %p619_p13, %p613_p10 }
  0x4a   :  { %493 = vmatpush3.bf16.msra.mxu0 %v492_v25 }
  0x4b   :  { %494 = vmatprep.subr.bf16.mxu0 %v645_v0 }
  0x4c   :  { %517 = vmatpush3.bf16.msra.mxu1 %v516_v45 }
  0x4d   :  { %518 = vmatprep.subr.bf16.mxu1 %v645_v0 }
  0x4e   :  { %496 = vmatpush3.bf16.msra.mxu0 %v495_v28 }
  0x4f   :  { %497 = vmatprep.subr.bf16.mxu0 %v645_v0 }
  0x50   :  { %520 = vmatpush3.bf16.msra.mxu1 %v519_v48 }
  0x51   :  { %521 = vmatprep.subr.bf16.mxu1 %v645_v0 }
  0x52   :  { %499 = vmatpush3.bf16.msra.mxu0 %v498_v31 }
  0x53   :  { %500 = vmatprep.subr.bf16.mxu0 %v645_v0 }
  0x54   :  { %523 = vmatpush3.bf16.msra.mxu1 %v522_v51 }
  0x55   :  { %524 = vmatprep.subr.bf16.mxu1 %v645_v0 }
  0x56   :  { %502 = vmatpush3.bf16.msra.mxu0 %v501_v34 }
  0x58   :  { %526 = vmatpush3.bf16.msra.mxu1 %v525_v54 }
  0x59   :  { %418 = vmatmul.mubr.f32.vlgmr.msra.gmra.mrb[0].mxu0 %v62_v35 }
  0x5a   :  { %420 = vmatprep.mubr.msk.f32.mxu0 %vm646_vm0, %v647_v1 }
  0x5d   :  { %421 = vmatmul.mubr.f32.gmra.mrb[2].mxu0 %v63_v36 }
  0x5e   :  { %423 = vmatprep.mubr.msk.f32.mxu0 %vm646_vm0, %v647_v1 }
  0x61   :  { %424 = vmatmul.mubr.f32.gmra.mrb[4].mxu0 %v64_v37 }
  0x62   :  { %426 = vmatprep.mubr.msk.f32.mxu0 %vm646_vm0, %v647_v1 }
  0x65   :  { %427 = vmatmul.mubr.f32.gmra.mrb[6].mxu0 %v65_v38 }
  0x66   :  { %429 = vmatprep.mubr.msk.f32.mxu0 %vm646_vm0, %v647_v1 }
  0x69   :  { %430 = vmatmul.mubr.f32.gmra.mrb[8].mxu0 %v66_v39 }
 0x12c   :  { %v156_v56 = vpop.f32.mrb[0].mxu0 }
 0x12d   :  { %v157_v57 = vadd.f32 %v341_v55, %v156_v56  ;;  %v419_v58 = vpop.f32.mrb[1].mxu0 }
 0x12f   :  { %v185_v59 = vmul.f32 0.70710677, %v157_v57  ;;  %v180_v10 = vmul.f32 0.5, %v157_v57 }
 0x130   :  { %v161_v60 = vpop.f32.mrb[2].mxu0 }
 0x131   :  { %536 = verf.f32 %v185_v59  ;;  %v162_v61 = vadd.f32 %v341_v55, %v161_v60  ;;  %v422_v62 = vpop.f32.mrb[3].mxu0 }
 0x133   :  { %v186_v63 = vmul.f32 0.70710677, %v162_v61  ;;  %v181_v18 = vmul.f32 0.5, %v162_v61 }
 0x134   :  { %v166_v2 = vpop.f32.mrb[4].mxu0 }
 0x135   :  { %538 = verf.f32 %v186_v63  ;;  %v167_v0 = vadd.f32 %v341_v55, %v166_v2  ;;  %v425_v3 = vpop.f32.mrb[5].mxu0 }
 0x137   :  { %v187_v4 = vmul.f32 0.70710677, %v167_v0  ;;  %v182_v22 = vmul.f32 0.5, %v167_v0 }
 0x138   :  { %v171_v5 = vpop.f32.mrb[6].mxu0 }
 0x139   :  { %540 = verf.f32 %v187_v4  ;;  %v172_v6 = vadd.f32 %v341_v55, %v171_v5  ;;  %v428_v7 = vpop.f32.mrb[7].mxu0 }
 0x13b   :  { %v537_v8 = vpop.eup %536  ;;  %v188_v9 = vmul.f32 0.70710677, %v172_v6  ;;  %v183_v26 = vmul.f32 0.5, %v172_v6 }
 0x13c   :  { %v195_v11 = vadd.f32 1.0, %v537_v8  ;;  %v176_v12 = vpop.f32.mrb[8].mxu0 }
 0x13d   :  { %542 = verf.f32 %v188_v9  ;;  %v177_v13 = vadd.f32 %v341_v55, %v176_v12  ;;  %v431_v14 = vpop.f32.mrb[9].mxu0 }
 0x13e   :  { %v200_v15 = vmul.f32 %v195_v11, %v180_v10 }
 0x13f   :  { %v539_v16 = vpop.eup %538  ;;  %v189_v17 = vmul.f32 0.70710677, %v177_v13  ;;  %v184_v30 = vmul.f32 0.5, %v177_v13 }
 0x140   :  { %v196_v19 = vadd.f32 1.0, %v539_v16  ;;  %465 = vmatmul.mubr.f32.vlgmr.msra.gmra.mrb[0].mxu1 %v200_v15 }
 0x141   :  { %544 = verf.f32 %v189_v17  ;;  %467 = vmatprep.mubr.msk.f32.mxu1 %vm646_vm0, %v647_v1 }
 0x142   :  { %v201_v20 = vmul.f32 %v196_v19, %v181_v18 }
 0x143   :  { %v541_v21 = vpop.eup %540 }
 0x144   :  { %v197_v23 = vadd.f32 1.0, %v541_v21  ;;  %468 = vmatmul.mubr.f32.gmra.mrb[2].mxu1 %v201_v20 }
 0x145   :  { %470 = vmatprep.mubr.msk.f32.mxu1 %vm646_vm0, %v647_v1 }
 0x146   :  { %v202_v24 = vmul.f32 %v197_v23, %v182_v22 }
 0x147   :  { %v543_v25 = vpop.eup %542 }
 0x148   :  { %v198_v27 = vadd.f32 1.0, %v543_v25  ;;  %471 = vmatmul.mubr.f32.gmra.mrb[4].mxu1 %v202_v24 }
 0x149   :  { %473 = vmatprep.mubr.msk.f32.mxu1 %vm646_vm0, %v647_v1 }
 0x14a   :  { %v203_v28 = vmul.f32 %v198_v27, %v183_v26 }
 0x14b   :  { %v545_v29 = vpop.eup %544 }
 0x14c   :  { %v199_v31 = vadd.f32 1.0, %v545_v29  ;;  %474 = vmatmul.mubr.f32.gmra.mrb[6].mxu1 %v203_v28 }
 0x14d   :  { %476 = vmatprep.mubr.msk.f32.mxu1 %vm646_vm0, %v647_v1 }
 0x14e   :  { %v204_v32 = vmul.f32 %v199_v31, %v184_v30 }
 0x150   :  { %477 = vmatmul.mubr.f32.gmra.mrb[8].mxu1 %v204_v32 }
 0x213   :  { %v294_v34 = vpop.f32.mrb[0].mxu1 }
 0x214   :  { %v295_v35 = vadd.f32 %v342_v33, %v294_v34  ;;  %v466_v36 = vpop.f32.mrb[1].mxu1 }
 0x216   :  { %318 = vst [vmem:[#allocation8] sm:$0xff] %v295_v35 }
 0x217   :  { %v299_v37 = vpop.f32.mrb[2].mxu1 }
 0x218   :  { %v300_v38 = vadd.f32 %v342_v33, %v299_v37  ;;  %v469_v39 = vpop.f32.mrb[3].mxu1 }
 0x21a   :  { %319 = vst [vmem:[#allocation8 + $0x8] sm:$0xff] %v300_v38 }
 0x21b   :  { %v304_v40 = vpop.f32.mrb[4].mxu1 }
 0x21c   :  { %v305_v41 = vadd.f32 %v342_v33, %v304_v40  ;;  %v472_v42 = vpop.f32.mrb[5].mxu1 }
 0x21e   :  { %320 = vst [vmem:[#allocation8 + $0x10] sm:$0xff] %v305_v41 }
 0x21f   :  { %v309_v43 = vpop.f32.mrb[6].mxu1 }
 0x220   :  { %v310_v1 = vadd.f32 %v342_v33, %v309_v43  ;;  %v475_v44 = vpop.f32.mrb[7].mxu1 }
 0x222   :  { %321 = vst [vmem:[#allocation8 + $0x18] sm:$0xff] %v310_v1 }
 0x223   :  { %v314_v45 = vpop.f32.mrb[8].mxu1 }
 0x224   :  { %v315_v46 = vadd.f32 %v342_v33, %v314_v45  ;;  %v478_v47 = vpop.f32.mrb[9].mxu1 }
 0x226   :  { %322 = vst [vmem:[#allocation8 + $0x20] sm:$0xff] %v315_v46 }
 0x227   :  { %623 = shalt.err (!%p620_p0)
}
 0x228   :  { %s624_s12 = scalar_lea.hbm %s793_s5, 640 }
 0x229   :  { %p625_p1 = scmp.ne.s32.totalorder %s793_s5, %s624_s12  ;;  %p628_p2 = scmp.lt.u32.totalorder %s624_s12, %s793_s5 }
 0x22b   :  { %p630_p3 = pnand %p628_p2, %p625_p1 }
 0x22d   :  { %633 = shalt.err (!%p630_p3)
}
 0x22e   :  { %334 = dma.vmem_to_hbm [thread:$0]  %s329_s9, 640, %s793_s5, [#allocation4], %s642_s30, %s642_s30, %s643_s6  }
 0x22f   :  { %638 = dma.done.wait [#allocation4], 640  }
 0x230   :  { %639 = vsyncadd [#allocation4], 4294966656 }
 0x231   :  { %338 = vsyncpa [#allocation3], 1 }
 0x232   :  { %339 = vsyncpa [#allocation6], 1 }
 0x233   :  { %340 = vsyncpa [#allocation4], 1 }

// kernel: tpu_custom_call.1
= control target key start
LH: loop header
LB: loop body
LE: loop exit
PB: predicated region body
PF: predicated region fallthrough
CT: control target
= control target key end

     0   :  { %10 = vsyncpa [#allocation3], 0  ;;  %s788_s0 = inlined_call_operand.hbm [shape: f32[40,128], index: 0, kind: input, shape index: {}]   ;;  %s789_s1 = inlined_call_operand.hbm [shape: f32[128,128], index: 1, kind: input, shape index: {}]   ;;  %s790_s2 = inlined_call_operand.vmem [shape: f32[1,128], index: 2, kind: input, shape index: {}]   ;;  %s791_s3 = inlined_call_operand.hbm [shape: f32[128,128], index: 3, kind: input, shape index: {}]   ;;  %s792_s4 = inlined_call_operand.vmem [shape: f32[1,128], index: 4, kind: input, shape index: {}]   ;;  %s793_s5 = inlined_call_operand.hbm [shape: f32[40,128], index: 5, kind: output, shape index: {}]  }
   0x1   :  { %11 = vsyncpa [#allocation6], 0 }
   0x2   :  { %12 = vsyncpa [#allocation4], 0  ;;  %s640_s18 = smov [#allocation5]   ;;  %s641_s20 = smov [#allocation2]  }
   0x3   :  { %s30_s19 = sshll.u32 %s640_s18, 4  ;;  %s18_s21 = sshll.u32 %s641_s20, 4  ;;  %s31_s19 = int_to_ptr.vmem [resolvable:$true] %s30_s19  ;;  %s679_s21 = int_to_ptr.vmem [resolvable:$true] %s18_s21 }
   0x4   :  { %s546_s24 = scalar_lea.hbm %s789_s1, 2048 }
   0x5   :  { %p547_p0 = scmp.ne.s32.totalorder %s789_s1, %s546_s24  ;;  %p550_p1 = scmp.lt.u32.totalorder %s546_s24, %s789_s1 }
   0x7   :  { %p552_p2 = pnand %p550_p1, %p547_p0 }
   0x9   :  { %555 = shalt.err (!%p552_p2)
}
   0xa   :  { %s556_s29 = scalar_lea.vmem %s31_s19, 2048  ;;  %p561_p4 = scmp.lt.s32.totalorder %s31_s19, %s31_s19 }
   0xb   :  { %p557_p3 = scmp.ne.s32.totalorder %s31_s19, %s556_s29  ;;  %p562_p5 = scmp.lt.s32.totalorder %s556_s29, %s556_s29 }
   0xd   :  { %p563_p6 = por %p562_p5, %p561_p4 }
   0xf   :  { %p564_p7 = pnand %p563_p6, %p557_p3 }
  0x11   :  { %567 = shalt.err (!%p564_p7)
}
  0x12   :  { %s642_s30 = smov 128   ;;  %s643_s6 = smov 8  }
  0x13   :  { %36 = dma.hbm_to_vmem [thread:$0]  %s789_s1, 2048, %s31_s19, [#allocation6], %s642_s30, %s642_s30, %s643_s6  }
  0x14   :  { %s568_s11 = scalar_lea.hbm %s788_s0, 640 }
  0x15   :  { %p569_p8 = scmp.ne.s32.totalorder %s788_s0, %s568_s11  ;;  %p572_p9 = scmp.lt.u32.totalorder %s568_s11, %s788_s0 }
  0x17   :  { %p574_p10 = pnand %p572_p9, %p569_p8 }
  0x19   :  { %577 = shalt.err (!%p574_p10)
}
  0x1a   :  { %s578_s16 = scalar_lea.vmem %s679_s21, 640  ;;  %p583_p12 = scmp.lt.s32.totalorder %s679_s21, %s679_s21 }
  0x1b   :  { %p579_p11 = scmp.ne.s32.totalorder %s679_s21, %s578_s16  ;;  %p584_p13 = scmp.lt.s32.totalorder %s578_s16, %s578_s16 }
  0x1d   :  { %p585_p0 = por %p584_p13, %p583_p12 }
  0x1f   :  { %p586_p1 = pnand %p585_p0, %p579_p11 }
  0x21   :  { %589 = shalt.err (!%p586_p1)
}
  0x22   :  { %24 = dma.hbm_to_vmem [thread:$0]  %s788_s0, 640, %s679_s21, [#allocation3], %s642_s30, %s642_s30, %s643_s6  }
  0x23   :  { %s644_s18 = smov [#allocation7]   ;;  %s590_s23 = scalar_lea.hbm %s791_s3, 2048 }
  0x24   :  { %s44_s19 = sshll.u32 %s644_s18, 4  ;;  %p591_p2 = scmp.ne.s32.totalorder %s791_s3, %s590_s23  ;;  %s45_s19 = int_to_ptr.vmem [resolvable:$true] %s44_s19 }
  0x25   :  { %p594_p3 = scmp.lt.u32.totalorder %s590_s23, %s791_s3 }
  0x27   :  { %p596_p4 = pnand %p594_p3, %p591_p2 }
  0x29   :  { %599 = shalt.err (!%p596_p4)
}
  0x2a   :  { %s600_s28 = scalar_lea.vmem %s45_s19, 2048  ;;  %p605_p6 = scmp.lt.s32.totalorder %s45_s19, %s45_s19 }
  0x2b   :  { %p601_p5 = scmp.ne.s32.totalorder %s45_s19, %s600_s28  ;;  %p606_p7 = scmp.lt.s32.totalorder %s600_s28, %s600_s28 }
  0x2d   :  { %p607_p8 = por %p606_p7, %p605_p6 }
  0x2f   :  { %p608_p9 = pnand %p607_p8, %p601_p5 }
  0x31   :  { %611 = shalt.err (!%p608_p9)
}
  0x32   :  { %50 = dma.hbm_to_vmem [thread:$0]  %s791_s3, 2048, %s45_s19, [#allocation6], %s642_s30, %s642_s30, %s643_s6  }
  0x33   :  { %634 = dma.done.wait [#allocation3], 640  }
  0x34   :  { %635 = vsyncadd [#allocation3], 4294966656 }
  0x35   :  { %636 = dma.done.wait [#allocation6], 4096  }
  0x36   :  { %637 = vsyncadd [#allocation6], 4294963200  ;;  %v645_v0 = vmov 0.0|0.0   ;;  %vm646_vm0 = vmmov 0   ;;  %v647_v1 = vmov 0.0   ;;  %v67_v2 = vld [vmem:[#allocation5] sm:$0xff] }
  0x37   :  { %479 = vmatprep.subr.bf16.mxu0 %v645_v0  ;;  %417 = vmatprep.mubr.msk.f32.mxu0 %vm646_vm0, %v647_v1  ;;  %v68_v3 = vld [vmem:[#allocation5 + $0x8] sm:$0xff]  ;;  %v69_v4 = vld [vmem:[#allocation5 + $0x10] sm:$0xff]  ;;  %v70_v6 = vld [vmem:[#allocation5 + $0x18] sm:$0xff]  ;;  %s648_s8 = smov [#allocation8]  }
  0x38   :  { %503 = vmatprep.subr.bf16.mxu1 %v645_v0  ;;  %464 = vmatprep.mubr.msk.f32.mxu1 %vm646_vm0, %v647_v1  ;;  %v480_v5 = vpack.c.bf16 %v68_v3, %v67_v2  ;;  %v483_v7 = vpack.c.bf16 %v70_v6, %v69_v4  ;;  %v71_v8 = vld [vmem:[#allocation5 + $0x20] sm:$0xff]  ;;  %v72_v9 = vld [vmem:[#allocation5 + $0x28] sm:$0xff]  ;;  %v207_v13 = vld [vmem:[#allocation7 + $0x10] sm:$0xff]  ;;  %s328_s9 = sshll.u32 %s648_s8, 4  ;;  %s329_s9 = int_to_ptr.vmem [resolvable:$true] %s328_s9 }
  0x39   :  { %v486_v10 = vpack.c.bf16 %v72_v9, %v71_v8  ;;  %v205_v11 = vld [vmem:[#allocation7] sm:$0xff]  ;;  %v206_v12 = vld [vmem:[#allocation7 + $0x8] sm:$0xff]  ;;  %v73_v14 = vld [vmem:[#allocation5 + $0x30] sm:$0xff]  ;;  %p617_p11 = scmp.lt.s32.totalorder %s329_s9, %s329_s9 }
  0x3a   :  { %481 = vmatpush3.bf16.msra.mxu0 %v480_v5  ;;  %v74_v15 = vld [vmem:[#allocation5 + $0x38] sm:$0xff]  ;;  %v504_v16 = vpack.c.bf16 %v206_v12, %v205_v11  ;;  %v209_v20 = vld [vmem:[#allocation7 + $0x20] sm:$0xff]  ;;  %v210_v21 = vld [vmem:[#allocation7 + $0x28] sm:$0xff] }
  0x3b   :  { %482 = vmatprep.subr.bf16.mxu0 %v645_v0  ;;  %v208_v17 = vld [vmem:[#allocation7 + $0x18] sm:$0xff]  ;;  %v489_v19 = vpack.c.bf16 %v74_v15, %v73_v14  ;;  %v75_v22 = vld [vmem:[#allocation5 + $0x40] sm:$0xff]  ;;  %v76_v23 = vld [vmem:[#allocation5 + $0x48] sm:$0xff]  ;;  %v510_v24 = vpack.c.bf16 %v210_v21, %v209_v20 }
  0x3c   :  { %505 = vmatpush3.bf16.msra.mxu1 %v504_v16  ;;  %v507_v18 = vpack.c.bf16 %v208_v17, %v207_v13  ;;  %v492_v25 = vpack.c.bf16 %v76_v23, %v75_v22  ;;  %v77_v26 = vld [vmem:[#allocation5 + $0x50] sm:$0xff]  ;;  %v78_v27 = vld [vmem:[#allocation5 + $0x58] sm:$0xff]  ;;  %v79_v29 = vld [vmem:[#allocation5 + $0x60] sm:$0xff] }
  0x3d   :  { %506 = vmatprep.subr.bf16.mxu1 %v645_v0  ;;  %v495_v28 = vpack.c.bf16 %v78_v27, %v77_v26  ;;  %v80_v30 = vld [vmem:[#allocation5 + $0x68] sm:$0xff]  ;;  %v81_v32 = vld [vmem:[#allocation5 + $0x70] sm:$0xff]  ;;  %v82_v33 = vld [vmem:[#allocation5 + $0x78] sm:$0xff] }
  0x3e   :  { %484 = vmatpush3.bf16.msra.mxu0 %v483_v7  ;;  %v498_v31 = vpack.c.bf16 %v80_v30, %v79_v29  ;;  %v501_v34 = vpack.c.bf16 %v82_v33, %v81_v32  ;;  %v62_v35 = vld [vmem:[#allocation2] sm:$0xff]  ;;  %v63_v36 = vld [vmem:[#allocation2 + $0x8] sm:$0xff]  ;;  %v64_v37 = vld [vmem:[#allocation2 + $0x10] sm:$0xff] }
  0x3f   :  { %485 = vmatprep.subr.bf16.mxu0 %v645_v0  ;;  %v65_v38 = vld [vmem:[#allocation2 + $0x18] sm:$0xff]  ;;  %v66_v39 = vld [vmem:[#allocation2 + $0x20] sm:$0xff]  ;;  %v213_v43 = vld [vmem:[#allocation7 + $0x40] sm:$0xff] }
  0x40   :  { %508 = vmatpush3.bf16.msra.mxu1 %v507_v18  ;;  %v211_v40 = vld [vmem:[#allocation7 + $0x30] sm:$0xff]  ;;  %v212_v41 = vld [vmem:[#allocation7 + $0x38] sm:$0xff]  ;;  %v214_v44 = vld [vmem:[#allocation7 + $0x48] sm:$0xff] }
  0x41   :  { %509 = vmatprep.subr.bf16.mxu1 %v645_v0  ;;  %v513_v42 = vpack.c.bf16 %v212_v41, %v211_v40  ;;  %v516_v45 = vpack.c.bf16 %v214_v44, %v213_v43  ;;  %v215_v46 = vld [vmem:[#allocation7 + $0x50] sm:$0xff]  ;;  %v216_v47 = vld [vmem:[#allocation7 + $0x58] sm:$0xff]  ;;  %v217_v49 = vld [vmem:[#allocation7 + $0x60] sm:$0xff] }
  0x42   :  { %487 = vmatpush3.bf16.msra.mxu0 %v486_v10  ;;  %v519_v48 = vpack.c.bf16 %v216_v47, %v215_v46  ;;  %v218_v50 = vld [vmem:[#allocation7 + $0x68] sm:$0xff]  ;;  %v219_v52 = vld [vmem:[#allocation7 + $0x70] sm:$0xff]  ;;  %v220_v53 = vld [vmem:[#allocation7 + $0x78] sm:$0xff] }
  0x43   :  { %488 = vmatprep.subr.bf16.mxu0 %v645_v0  ;;  %v522_v51 = vpack.c.bf16 %v218_v50, %v217_v49  ;;  %v525_v54 = vpack.c.bf16 %v220_v53, %v219_v52  ;;  %v341_v55 = vld [vmem:[%s790_s2] ss:$0 sm:$0xff] }
  0x44   :  { %511 = vmatpush3.bf16.msra.mxu1 %v510_v24  ;;  %v342_v33 = vld [vmem:[%s792_s4] ss:$0 sm:$0xff]  ;;  %s612_s4 = scalar_lea.vmem %s329_s9, 640 }
  0x45   :  { %512 = vmatprep.subr.bf16.mxu1 %v645_v0  ;;  %p613_p10 = scmp.ne.s32.totalorder %s329_s9, %s612_s4  ;;  %p618_p12 = scmp.lt.s32.totalorder %s612_s4, %s612_s4 }
  0x46   :  { %490 = vmatpush3.bf16.msra.mxu0 %v489_v19 }
  0x47   :  { %491 = vmatprep.subr.bf16.mxu0 %v645_v0  ;;  %p619_p13 = por %p618_p12, %p617_p11 }
  0x48   :  { %514 = vmatpush3.bf16.msra.mxu1 %v513_v42 }
  0x49   :  { %515 = vmatprep.subr.bf16.mxu1 %v645_v0  ;;  %p620_p0 = pnand %p619_p13, %p613_p10 }
  0x4a   :  { %493 = vmatpush3.bf16.msra.mxu0 %v492_v25 }
  0x4b   :  { %494 = vmatprep.subr.bf16.mxu0 %v645_v0 }
  0x4c   :  { %517 = vmatpush3.bf16.msra.mxu1 %v516_v45 }
  0x4d   :  { %518 = vmatprep.subr.bf16.mxu1 %v645_v0 }
  0x4e   :  { %496 = vmatpush3.bf16.msra.mxu0 %v495_v28 }
  0x4f   :  { %497 = vmatprep.subr.bf16.mxu0 %v645_v0 }
  0x50   :  { %520 = vmatpush3.bf16.msra.mxu1 %v519_v48 }
  0x51   :  { %521 = vmatprep.subr.bf16.mxu1 %v645_v0 }
  0x52   :  { %499 = vmatpush3.bf16.msra.mxu0 %v498_v31 }
  0x53   :  { %500 = vmatprep.subr.bf16.mxu0 %v645_v0 }
  0x54   :  { %523 = vmatpush3.bf16.msra.mxu1 %v522_v51 }
  0x55   :  { %524 = vmatprep.subr.bf16.mxu1 %v645_v0 }
  0x56   :  { %502 = vmatpush3.bf16.msra.mxu0 %v501_v34 }
  0x58   :  { %526 = vmatpush3.bf16.msra.mxu1 %v525_v54 }
  0x59   :  { %418 = vmatmul.mubr.f32.vlgmr.msra.gmra.mrb[0].mxu0 %v62_v35 }
  0x5a   :  { %420 = vmatprep.mubr.msk.f32.mxu0 %vm646_vm0, %v647_v1 }
  0x5d   :  { %421 = vmatmul.mubr.f32.gmra.mrb[2].mxu0 %v63_v36 }
  0x5e   :  { %423 = vmatprep.mubr.msk.f32.mxu0 %vm646_vm0, %v647_v1 }
  0x61   :  { %424 = vmatmul.mubr.f32.gmra.mrb[4].mxu0 %v64_v37 }
  0x62   :  { %426 = vmatprep.mubr.msk.f32.mxu0 %vm646_vm0, %v647_v1 }
  0x65   :  { %427 = vmatmul.mubr.f32.gmra.mrb[6].mxu0 %v65_v38 }
  0x66   :  { %429 = vmatprep.mubr.msk.f32.mxu0 %vm646_vm0, %v647_v1 }
  0x69   :  { %430 = vmatmul.mubr.f32.gmra.mrb[8].mxu0 %v66_v39 }
 0x12c   :  { %v156_v56 = vpop.f32.mrb[0].mxu0 }
 0x12d   :  { %v157_v57 = vadd.f32 %v341_v55, %v156_v56  ;;  %v419_v58 = vpop.f32.mrb[1].mxu0 }
 0x12f   :  { %v185_v59 = vmul.f32 0.70710677, %v157_v57  ;;  %v180_v10 = vmul.f32 0.5, %v157_v57 }
 0x130   :  { %v161_v60 = vpop.f32.mrb[2].mxu0 }
 0x131   :  { %536 = verf.f32 %v185_v59  ;;  %v162_v61 = vadd.f32 %v341_v55, %v161_v60  ;;  %v422_v62 = vpop.f32.mrb[3].mxu0 }
 0x133   :  { %v186_v63 = vmul.f32 0.70710677, %v162_v61  ;;  %v181_v18 = vmul.f32 0.5, %v162_v61 }
 0x134   :  { %v166_v2 = vpop.f32.mrb[4].mxu0 }
 0x135   :  { %538 = verf.f32 %v186_v63  ;;  %v167_v0 = vadd.f32 %v341_v55, %v166_v2  ;;  %v425_v3 = vpop.f32.mrb[5].mxu0 }
 0x137   :  { %v187_v4 = vmul.f32 0.70710677, %v167_v0  ;;  %v182_v22 = vmul.f32 0.5, %v167_v0 }
 0x138   :  { %v171_v5 = vpop.f32.mrb[6].mxu0 }
 0x139   :  { %540 = verf.f32 %v187_v4  ;;  %v172_v6 = vadd.f32 %v341_v55, %v171_v5  ;;  %v428_v7 = vpop.f32.mrb[7].mxu0 }
 0x13b   :  { %v537_v8 = vpop.eup %536  ;;  %v188_v9 = vmul.f32 0.70710677, %v172_v6  ;;  %v183_v26 = vmul.f32 0.5, %v172_v6 }
 0x13c   :  { %v195_v11 = vadd.f32 1.0, %v537_v8  ;;  %v176_v12 = vpop.f32.mrb[8].mxu0 }
 0x13d   :  { %542 = verf.f32 %v188_v9  ;;  %v177_v13 = vadd.f32 %v341_v55, %v176_v12  ;;  %v431_v14 = vpop.f32.mrb[9].mxu0 }
 0x13e   :  { %v200_v15 = vmul.f32 %v195_v11, %v180_v10 }
 0x13f   :  { %v539_v16 = vpop.eup %538  ;;  %v189_v17 = vmul.f32 0.70710677, %v177_v13  ;;  %v184_v30 = vmul.f32 0.5, %v177_v13 }
 0x140   :  { %v196_v19 = vadd.f32 1.0, %v539_v16  ;;  %465 = vmatmul.mubr.f32.vlgmr.msra.gmra.mrb[0].mxu1 %v200_v15 }
 0x141   :  { %544 = verf.f32 %v189_v17  ;;  %467 = vmatprep.mubr.msk.f32.mxu1 %vm646_vm0, %v647_v1 }
 0x142   :  { %v201_v20 = vmul.f32 %v196_v19, %v181_v18 }
 0x143   :  { %v541_v21 = vpop.eup %540 }
 0x144   :  { %v197_v23 = vadd.f32 1.0, %v541_v21  ;;  %468 = vmatmul.mubr.f32.gmra.mrb[2].mxu1 %v201_v20 }
 0x145   :  { %470 = vmatprep.mubr.msk.f32.mxu1 %vm646_vm0, %v647_v1 }
 0x146   :  { %v202_v24 = vmul.f32 %v197_v23, %v182_v22 }
 0x147   :  { %v543_v25 = vpop.eup %542 }
 0x148   :  { %v198_v27 = vadd.f32 1.0, %v543_v25  ;;  %471 = vmatmul.mubr.f32.gmra.mrb[4].mxu1 %v202_v24 }
 0x149   :  { %473 = vmatprep.mubr.msk.f32.mxu1 %vm646_vm0, %v647_v1 }
 0x14a   :  { %v203_v28 = vmul.f32 %v198_v27, %v183_v26 }
 0x14b   :  { %v545_v29 = vpop.eup %544 }
 0x14c   :  { %v199_v31 = vadd.f32 1.0, %v545_v29  ;;  %474 = vmatmul.mubr.f32.gmra.mrb[6].mxu1 %v203_v28 }
 0x14d   :  { %476 = vmatprep.mubr.msk.f32.mxu1 %vm646_vm0, %v647_v1 }
 0x14e   :  { %v204_v32 = vmul.f32 %v199_v31, %v184_v30 }
 0x150   :  { %477 = vmatmul.mubr.f32.gmra.mrb[8].mxu1 %v204_v32 }
 0x213   :  { %v294_v34 = vpop.f32.mrb[0].mxu1 }
 0x214   :  { %v295_v35 = vadd.f32 %v342_v33, %v294_v34  ;;  %v466_v36 = vpop.f32.mrb[1].mxu1 }
 0x216   :  { %318 = vst [vmem:[#allocation8] sm:$0xff] %v295_v35 }
 0x217   :  { %v299_v37 = vpop.f32.mrb[2].mxu1 }
 0x218   :  { %v300_v38 = vadd.f32 %v342_v33, %v299_v37  ;;  %v469_v39 = vpop.f32.mrb[3].mxu1 }
 0x21a   :  { %319 = vst [vmem:[#allocation8 + $0x8] sm:$0xff] %v300_v38 }
 0x21b   :  { %v304_v40 = vpop.f32.mrb[4].mxu1 }
 0x21c   :  { %v305_v41 = vadd.f32 %v342_v33, %v304_v40  ;;  %v472_v42 = vpop.f32.mrb[5].mxu1 }
 0x21e   :  { %320 = vst [vmem:[#allocation8 + $0x10] sm:$0xff] %v305_v41 }
 0x21f   :  { %v309_v43 = vpop.f32.mrb[6].mxu1 }
 0x220   :  { %v310_v1 = vadd.f32 %v342_v33, %v309_v43  ;;  %v475_v44 = vpop.f32.mrb[7].mxu1 }
 0x222   :  { %321 = vst [vmem:[#allocation8 + $0x18] sm:$0xff] %v310_v1 }
 0x223   :  { %v314_v45 = vpop.f32.mrb[8].mxu1 }
 0x224   :  { %v315_v46 = vadd.f32 %v342_v33, %v314_v45  ;;  %v478_v47 = vpop.f32.mrb[9].mxu1 }
 0x226   :  { %322 = vst [vmem:[#allocation8 + $0x20] sm:$0xff] %v315_v46 }
 0x227   :  { %623 = shalt.err (!%p620_p0)
}
 0x228   :  { %s624_s12 = scalar_lea.hbm %s793_s5, 640 }
 0x229   :  { %p625_p1 = scmp.ne.s32.totalorder %s793_s5, %s624_s12  ;;  %p628_p2 = scmp.lt.u32.totalorder %s624_s12, %s793_s5 }
 0x22b   :  { %p630_p3 = pnand %p628_p2, %p625_p1 }
 0x22d   :  { %633 = shalt.err (!%p630_p3)
}
 0x22e   :  { %334 = dma.vmem_to_hbm [thread:$0]  %s329_s9, 640, %s793_s5, [#allocation4], %s642_s30, %s642_s30, %s643_s6  }
 0x22f   :  { %638 = dma.done.wait [#allocation4], 640  }
 0x230   :  { %639 = vsyncadd [#allocation4], 4294966656 }
 0x231   :  { %338 = vsyncpa [#allocation3], 1 }
 0x232   :  { %339 = vsyncpa [#allocation6], 1 }
 0x233   :  { %340 = vsyncpa [#allocation4], 1 }

</bundles_post_ra>
